<compile_context>
chip_gen: v5e
topology: v5e:2x2
jax: 0.10.0
libtpu: 0.0.40
codegen_flags: <defaults>
</compile_context>

<pallas_src>
import math

import numpy as np

import jax
import jax.numpy as jnp
from jax.experimental import pallas as pl
from jax.experimental.pallas import tpu as pltpu


# ----------------------------------------------------------------------------- kernels

def _tape_kernel_packed(pos_ref, expand_ref, scale_ref, phase_ref, out_ref):
    """Lane-packed tile: out[r, p*D + d] = sin(pos[r, p] * scale[d] + phase[d]).

    pos_ref:    (TR, P)      positions (int or float)
    expand_ref: (P, lanes)   {0,1} matrix, expand[p, p*D:(p+1)*D] = 1
    scale_ref:  (1, lanes)   div_term * (D / length_sequence), tiled P times
    phase_ref:  (1, lanes)   0 on sin channels, pi/2 on cos channels, tiled P times
    out_ref:    (TR, lanes)  float32
    """
    pos = pos_ref[...].astype(jnp.float32)                       # (TR, P)

    # Exact 3-way bf16 split: hi + mid + lo == pos bit-exactly (f32 has <= 24 mantissa
    # bits <= 3 x 8). Each piece is bf16-representable, so the MXU lane-expansion below
    # is exact regardless of the matmul precision configuration. The split runs on the
    # narrow (TR, P) block, so its VALU cost is ~P/lanes of the output work.
    hi = pos.astype(jnp.bfloat16).astype(jnp.float32)
    r = pos - hi
    mid = r.astype(jnp.bfloat16).astype(jnp.float32)
    lo = r - mid

    e = expand_ref[...]                                           # (P, lanes) of {0., 1.}
    pos_wide = (jnp.dot(hi, e, preferred_element_type=jnp.float32)
                + jnp.dot(mid, e, preferred_element_type=jnp.float32)
                + jnp.dot(lo, e, preferred_element_type=jnp.float32))   # (TR, lanes)

    # Single transcendental per element: cos(x) == sin(x + pi/2) via per-lane phase.
    out_ref[...] = jnp.sin(pos_wide * scale_ref[...] + phase_ref[...])


def _tape_kernel_plain(pos_ref, scale_ref, phase_ref, out_ref):
    """Un-packed tile (P == 1): out[r, d] = sin(pos[r] * scale[d] + phase[d])."""
    pos = pos_ref[...].astype(jnp.float32)                        # (TR, 1)
    out_ref[...] = jnp.sin(pos * scale_ref[...] + phase_ref[...])


# ----------------------------------------------------------------------------- wrapper

def _pick_row_tile(rows: int, row_bytes: int, target_bytes: int = 2 * 1024 * 1024) -> int:
    """Largest multiple-of-8 divisor of `rows` giving ~target_bytes output tiles."""
    if rows % 8 != 0:
        return rows                              # tiny input: one full block (dim == array dim)
    cap = min(rows, max(8, target_bytes // max(row_bytes, 1)))
    if rows >= 16:
        cap = min(cap, rows // 2)                # keep >= 2 grid steps (megacore / pipelining)
    cap = max(8, (cap // 8) * 8)
    for t in range(cap, 7, -8):
        if rows % t == 0:
            return t
    return rows


def tape_forward(positions: jax.Array,
                 d_model: int,
                 length_sequence: int = 8482506,
                 w_k_constant: float = 10000.0) -> jax.Array:
    """positions: [B, S] (int or float) -> pe: [B, S, d_model] float32."""
    assert d_model % 2 == 0, "tAPE requires an even d_model"
    B, S = positions.shape
    D = d_model

    # Lane packing: pack P = 128 // D positions per 128-lane output row when possible
    # (lane-dense stores). Otherwise P = 1 (last dim = D on lanes).
    if D < 128 and 128 % D == 0 and (B * S) % (128 // D) == 0:
        P = 128 // D
    else:
        P = 1
    lanes = P * D
    R = (B * S) // P
    TR = _pick_row_tile(R, lanes * 4)
    grid = (R // TR,)

    # Per-lane constants (computed once in the wrapper, in f32 to match the torch path):
    # scale[d] = exp(2k * -ln(w)/D) * (D / L), phase[d] = 0 (sin) or pi/2 (cos).
    d_idx = np.arange(D)
    two_k = ((d_idx // 2) * 2).astype(np.float32)
    div_term = jnp.exp(jnp.asarray(two_k) * jnp.float32(-math.log(w_k_constant) / D))
    scale_d = div_term * jnp.float32(D / length_sequence)
    phase_d = jnp.asarray(np.where(d_idx % 2 == 0, 0.0, np.pi / 2.0).astype(np.float32))
    scale = jnp.tile(scale_d, P).reshape(1, lanes)
    phase = jnp.tile(phase_d, P).reshape(1, lanes)

    pos2d = positions.reshape(R, P)              # free row-major reshape

    pos_spec = pl.BlockSpec((TR, P), lambda i: (i, 0))
    vec_spec = pl.BlockSpec((1, lanes), lambda i: (0, 0))
    out_spec = pl.BlockSpec((TR, lanes), lambda i: (i, 0))

    if P > 1:
        expand_np = np.zeros((P, lanes), np.float32)
        for p in range(P):
            expand_np[p, p * D:(p + 1) * D] = 1.0
        expand = jnp.asarray(expand_np)
        kernel = _tape_kernel_packed
        inputs = (pos2d, expand, scale, phase)
        in_specs = [pos_spec,
                    pl.BlockSpec((P, lanes), lambda i: (0, 0)),
                    vec_spec, vec_spec]
    else:
        kernel = _tape_kernel_plain
        inputs = (pos2d, scale, phase)
        in_specs = [pos_spec, vec_spec, vec_spec]

    out2d = pl.pallas_call(
        kernel,
        out_shape=jax.ShapeDtypeStruct((R, lanes), jnp.float32),
        grid_spec=pltpu.PrefetchScalarGridSpec(
            num_scalar_prefetch=0,
            grid=grid,
            in_specs=in_specs,
            out_specs=out_spec,
        ),
        compiler_params=pltpu.CompilerParams(
            dimension_semantics=("parallel",),
            vmem_limit_bytes=32 * 1024 * 1024),
    )(*inputs)

    return out2d.reshape(B, S, D)                # free row-major reshape back


# ----------------------------------------------------------------------------- reference

def tape_reference(positions: jax.Array,
                   d_model: int,
                   length_sequence: int = 8482506,
                   w_k_constant: float = 10000.0) -> jax.Array:
    """Pure-JAX reference mirroring the PyTorch code path (sin/cos channels)."""
    B, S = positions.shape
    pos = positions.reshape(S, B).astype(jnp.float32)[..., None]          # (S, B, 1)
    div_term = jnp.exp(jnp.arange(0, d_model, 2, dtype=jnp.float32)
                       * (-math.log(w_k_constant) / d_model)).reshape(1, 1, -1)
    norm_const = d_model / length_sequence
    ang = pos * div_term * norm_const                                     # (S, B, D/2)
    pe = jnp.zeros((S, B, d_model), jnp.float32)
    pe = pe.at[:, :, 0::2].set(jnp.sin(ang))
    pe = pe.at[:, :, 1::2].set(jnp.cos(ang))
    return pe.reshape(B, S, d_model)


if __name__ == "__main__":
    # tAPE has no learnable weights; hyper-params set deterministically.
    d_model = 32
    length_sequence = 8482506
    w_k_constant = 10000.0

    B, S = 2, 16
    key = jax.random.PRNGKey(0)
    positions = jax.random.randint(key, (B, S), minval=0, maxval=length_sequence,
                                   dtype=jnp.int32)

    pe = tape_forward(positions, d_model, length_sequence, w_k_constant)
    pe = jax.block_until_ready(pe)

    ref = tape_reference(positions, d_model, length_sequence, w_k_constant)
    assert pe.shape == (B, S, d_model)
    assert pe.dtype == jnp.float32
    assert jnp.allclose(pe, ref, atol=2e-5, rtol=1e-5), "mismatch vs reference"

    print("KERNEL_OK")
</pallas_src>

<mosaic_0001>
module attributes {stable_mosaic.version = 11 : i64} {
  func.func @_tape_kernel_packed(%arg0: i32, %arg1: memref<8x4xi32, #tpu.memory_space<vmem>>, %arg2: memref<4x128xf32, #tpu.memory_space<vmem>>, %arg3: memref<1x128xf32, #tpu.memory_space<vmem>>, %arg4: memref<1x128xf32, #tpu.memory_space<vmem>>, %arg5: memref<8x128xf32, #tpu.memory_space<vmem>>) attributes {dimension_semantics = [#tpu.dimension_semantics<parallel>], iteration_bounds = array<i64: 1>, scalar_prefetch = 0 : i64, scratch_operands = 0 : i64, tpu.core_type = #tpu.core_type<tc>, window_params = [{transform_indices = @transform_0, window_bounds = array<i64: 8, 4>}, {pipeline_mode = #tpu.pipeline_mode<synchronous>, transform_indices = @transform_1, window_bounds = array<i64: 4, 128>}, {pipeline_mode = #tpu.pipeline_mode<synchronous>, transform_indices = @transform_2, window_bounds = array<i64: 1, 128>}, {pipeline_mode = #tpu.pipeline_mode<synchronous>, transform_indices = @transform_3, window_bounds = array<i64: 1, 128>}, {transform_indices = @transform_4, window_bounds = array<i64: 8, 128>}]} {
    %c0 = arith.constant 0 : index
    %c0_0 = arith.constant 0 : index
    %0 = vector.load %arg1[%c0, %c0_0] : memref<8x4xi32, #tpu.memory_space<vmem>>, vector<8x4xi32>
    %1 = arith.sitofp %0 : vector<8x4xi32> to vector<8x4xf32>
    %2 = arith.truncf %1 : vector<8x4xf32> to vector<8x4xbf16>
    %3 = arith.extf %2 : vector<8x4xbf16> to vector<8x4xf32>
    %4 = arith.subf %1, %3 : vector<8x4xf32>
    %5 = arith.truncf %4 : vector<8x4xf32> to vector<8x4xbf16>
    %6 = arith.extf %5 : vector<8x4xbf16> to vector<8x4xf32>
    %7 = arith.subf %4, %6 : vector<8x4xf32>
    %c0_1 = arith.constant 0 : index
    %c0_2 = arith.constant 0 : index
    %8 = vector.load %arg2[%c0_1, %c0_2] : memref<4x128xf32, #tpu.memory_space<vmem>>, vector<4x128xf32>
    %cst = arith.constant dense<0.000000e+00> : vector<8x128xf32>
    %9 = tpu.matmul %3, %8, %cst {dimension_numbers = #tpu.dot_dimension_numbers<[1], [0], [0], [1], [0, 0, 1, 1], [], []>} : vector<8x4xf32>, vector<4x128xf32>, vector<8x128xf32> -> vector<8x128xf32>
    %cst_3 = arith.constant dense<0.000000e+00> : vector<8x128xf32>
    %10 = tpu.matmul %6, %8, %cst_3 {dimension_numbers = #tpu.dot_dimension_numbers<[1], [0], [0], [1], [0, 0, 1, 1], [], []>} : vector<8x4xf32>, vector<4x128xf32>, vector<8x128xf32> -> vector<8x128xf32>
    %11 = arith.addf %9, %10 : vector<8x128xf32>
    %cst_4 = arith.constant dense<0.000000e+00> : vector<8x128xf32>
    %12 = tpu.matmul %7, %8, %cst_4 {dimension_numbers = #tpu.dot_dimension_numbers<[1], [0], [0], [1], [0, 0, 1, 1], [], []>} : vector<8x4xf32>, vector<4x128xf32>, vector<8x128xf32> -> vector<8x128xf32>
    %13 = arith.addf %11, %12 : vector<8x128xf32>
    %c0_5 = arith.constant 0 : index
    %c0_6 = arith.constant 0 : index
    %14 = vector.load %arg3[%c0_5, %c0_6] : memref<1x128xf32, #tpu.memory_space<vmem>>, vector<1x128xf32>
    %15 = vector.broadcast %14 : vector<1x128xf32> to vector<8x128xf32>
    %16 = arith.mulf %13, %15 : vector<8x128xf32>
    %c0_7 = arith.constant 0 : index
    %c0_8 = arith.constant 0 : index
    %17 = vector.load %arg4[%c0_7, %c0_8] : memref<1x128xf32, #tpu.memory_space<vmem>>, vector<1x128xf32>
    %18 = vector.broadcast %17 : vector<1x128xf32> to vector<8x128xf32>
    %19 = arith.addf %16, %18 : vector<8x128xf32>
    %20 = math.sin %19 : vector<8x128xf32>
    %c0_9 = arith.constant 0 : index
    %c0_10 = arith.constant 0 : index
    %21 = vector.load %arg5[%c0_9, %c0_10] : memref<8x128xf32, #tpu.memory_space<vmem>>, vector<8x128xf32>
    tpu.vector_store %arg5[%c0_9, %c0_10], %20 {strides = array<i32>} : memref<8x128xf32, #tpu.memory_space<vmem>>, vector<8x128xf32>,
    return
  }
  func.func @transform_0(%arg0: i32) -> (i32, i32) {
    %c0_i32 = arith.constant 0 : i32
    %c0_i32_0 = arith.constant 0 : i32
    return %arg0, %c0_i32 : i32, i32
  }
  func.func @transform_1(%arg0: i32) -> (i32, i32) {
    %c0_i32 = arith.constant 0 : i32
    %c0_i32_0 = arith.constant 0 : i32
    %c0_i32_1 = arith.constant 0 : i32
    return %c0_i32, %c0_i32_0 : i32, i32
  }
  func.func @transform_2(%arg0: i32) -> (i32, i32) {
    %c0_i32 = arith.constant 0 : i32
    %c0_i32_0 = arith.constant 0 : i32
    %c0_i32_1 = arith.constant 0 : i32
    return %c0_i32, %c0_i32_0 : i32, i32
  }
  func.func @transform_3(%arg0: i32) -> (i32, i32) {
    %c0_i32 = arith.constant 0 : i32
    %c0_i32_0 = arith.constant 0 : i32
    %c0_i32_1 = arith.constant 0 : i32
    return %c0_i32, %c0_i32_0 : i32, i32
  }
  func.func @transform_4(%arg0: i32) -> (i32, i32) {
    %c0_i32 = arith.constant 0 : i32
    %c0_i32_0 = arith.constant 0 : i32
    return %arg0, %c0_i32 : i32, i32
  }
}

</mosaic_0001>

<bundles_post_ra>
// kernel: tpu_custom_call.1
= control target key start
LH: loop header
LB: loop body
LE: loop exit
PB: predicated region body
PF: predicated region fallthrough
CT: control target
= control target key end

     0   :  { %vm31_vm0 = vcmask 1043456   ;;  %s431_s0 = inlined_call_operand.vmem [shape: s32[8,4], index: 0, kind: input, shape index: {}]   ;;  %s432_s1 = inlined_call_operand.vmem [shape: f32[4,128], index: 1, kind: input, shape index: {}]   ;;  %s433_s2 = inlined_call_operand.vmem [shape: f32[1,128], index: 2, kind: input, shape index: {}]   ;;  %s434_s3 = inlined_call_operand.vmem [shape: f32[1,128], index: 3, kind: input, shape index: {}]   ;;  %s435_s4 = inlined_call_operand.hbm [shape: f32[8,128], index: 4, kind: output, shape index: {}]  }
   0x1   :  { %v26_v0 = vld [vmem:[%s432_s1] sm:$0xf] }
   0x2   :  { %v18_v1 = vld [vmem:[%s431_s0] sm:$0xff]  ;;  %288 = vmatpush.msk.msra.mxu2 %vm31_vm0, %v26_v0  ;;  %284 = vmatpush.msk.msra.mxu0 %vm31_vm0, %v26_v0 }
   0x3   :  { %v19_v2 = vcvt.s32.f32 %v18_v1 }
   0x4   :  { %9 = vsyncpa [#allocation3], 0  ;;  %286 = vmatpush.msk.msra.mxu1 %vm31_vm0, %v26_v0  ;;  %vm27_vm1 = vcmask 31744   ;;  %v301_v12 = vld [vmem:[%s433_s2] ss:$0 sm:$0xff]  ;;  %s336_s2 = smov [#allocation2]  }
   0x5   :  { %v20_v3 = vpack.c.bf16 %v19_v2, %v19_v2  ;;  %v302_v15 = vld [vmem:[%s434_s3] ss:$0 sm:$0xff]  ;;  %v329_v29 = vmov 2102212464   ;;  %v330_v31 = vmov 920167782  }
   0x6   :  { %v331_v34 = vmov 1326507024   ;;  %v332_v36 = vmov 683565275   ;;  %v333_v38 = vmov 2475754826  }
   0x7   :  { %v21_v4 = vunpack.c.l.bf16 %v20_v3  ;;  %v334_v41 = vmov 2131351028   ;;  %s273_s3 = sshll.u32 %s336_s2, 4  ;;  %s275_s23 = sshll.u32 %s435_s4, 4  ;;  %s274_s3 = int_to_ptr.vmem [resolvable:$true] %s273_s3  ;;  %s276_s23 = int_to_ptr.hbm [resolvable:$true] %s275_s23 }
   0x9   :  { %v22_v5 = vsub.f32 %v19_v2, %v21_v4  ;;  %287 = vmatmul.msk.f32.vlgmr.msra.gmra.mxu1 %vm27_vm1, %v21_v4 }
   0xb   :  { %v23_v6 = vpack.c.bf16 %v22_v5, %v22_v5 }
   0xd   :  { %v24_v7 = vunpack.c.l.bf16 %v23_v6 }
   0xf   :  { %v25_v8 = vsub.f32 %v22_v5, %v24_v7  ;;  %285 = vmatmul.msk.f32.vlgmr.msra.gmra.mxu0 %vm27_vm1, %v24_v7 }
  0x11   :  { %289 = vmatmul.msk.f32.vlgmr.msra.gmra.mxu2 %vm27_vm1, %v25_v8 }
  0x86   :  { %v75_v10 = vpop.f32.mrf.mxu1 }
  0x8c   :  { %v52_v9 = vpop.f32.mrf.mxu0 }
  0x8d   :  { %v76_v11 = vadd.f32 %v75_v10, %v52_v9 }
  0x94   :  { %v98_v13 = vpop.f32.mrf.mxu2 }
  0x95   :  { %v101_v14 = vadd.f32 %v98_v13, %v76_v11 }
  0x97   :  { %v106_v16 = vmul.f32 %v301_v12, %v101_v14 }
  0x99   :  { %v374_v17 = vadd.f32 %v302_v15, %v106_v16  ;;  %v335_v15 = vmov 0  }
  0x9b   :  { %v115_v18 = vand.u32 2139095040, %v374_v17  ;;  %v112_v21 = vand.u32 2147483647, %v374_v17  ;;  %vm114_vm14 = vcmp.lt.s32.totalorder %v374_v17, 0 }
  0x9d   :  { %v116_v19 = vshrl.u32 %v115_v18, 23  ;;  %v119_v23 = vand.u32 8388607, %v112_v21  ;;  %vm113_vm15 = vcmp.le.f32.partialorder %v112_v21, 0.7853982 }
  0x9f   :  { %v290_v20 = vadd.s32 4294967169, %v116_v19  ;;  %v120_v27 = vor.u32 8388608, %v119_v23 }
  0xa1   :  { %v122_v22 = vadd.s32 1, %v290_v20  ;;  %v389_v48 = vshll.u32 %v120_v27, 8 }
  0xa3   :  { %vm123_vm2 = vcmp.gt.s32.totalorder %v122_v22, 0  ;;  %v161_v58 = vand.u32 65535, %v389_v48  ;;  %v162_v60 = vshrl.u32 %v389_v48, 16 }
  0xa4   :  { %v124_v24 = vsel %vm123_vm2, %v122_v22, 0 }
  0xa5   :  { %v126_v25 = vand.u32 31, %v124_v24  ;;  %v382_v28 = vshrl.u32 %v124_v24, 5 }
  0xa7   :  { %v380_v26 = vsub.s32 32, %v126_v25  ;;  %v138_v30 = vshll.u32 %v329_v29, %v126_v25  ;;  %v141_v32 = vshll.u32 %v330_v31, %v126_v25  ;;  %v129_v37 = vshll.u32 %v332_v36, %v126_v25 }
  0xa8   :  { %v132_v40 = vshll.u32 %v333_v38, %v126_v25  ;;  %v135_v43 = vshll.u32 %v334_v41, %v126_v25  ;;  %vm147_vm3 = vcmp.lt.s32.totalorder %v382_v28, 4  ;;  %vm144_vm4 = vcmp.lt.s32.totalorder %v382_v28, 1 }
  0xa9   :  { %v139_v33 = vshrl.u32 %v330_v31, %v380_v26  ;;  %v142_v35 = vshrl.u32 %v331_v34, %v380_v26  ;;  %v130_v39 = vshrl.u32 %v333_v38, %v380_v26  ;;  %v133_v42 = vshrl.u32 %v334_v41, %v380_v26 }
  0xaa   :  { %v136_v44 = vshrl.u32 %v329_v29, %v380_v26  ;;  %vm146_vm5 = vcmp.lt.s32.totalorder %v382_v28, 3  ;;  %vm145_vm6 = vcmp.lt.s32.totalorder %v382_v28, 2  ;;  %v128_v22 = vshrl.u32 %v332_v36, %v380_v26 }
  0xab   :  { %v140_v45 = vor.u32 %v139_v33, %v138_v30  ;;  %v143_v46 = vor.u32 %v142_v35, %v141_v32  ;;  %v131_v47 = vor.u32 %v130_v39, %v129_v37  ;;  %v134_v49 = vor.u32 %v133_v42, %v132_v40 }
  0xac   :  { %v137_v50 = vor.u32 %v136_v44, %v135_v43 }
  0xad   :  { %v153_v51 = vsel %vm147_vm3, %v140_v45, 920167782  ;;  %v157_v52 = vsel %vm147_vm3, %v143_v46, 1326507024  ;;  %v152_v53 = vsel %vm144_vm4, %v131_v47, %v134_v49  ;;  %v148_v30 = vsel %vm144_vm4, %v128_v22, %v131_v47 }
  0xae   :  { %v154_v54 = vsel %vm146_vm5, %v137_v50, %v153_v51  ;;  %v156_v55 = vsel %vm144_vm4, %v134_v49, %v137_v50  ;;  %v158_v57 = vsel %vm146_vm5, %v140_v45, %v157_v52  ;;  %v149_v18 = vsel %vm147_vm3, %v137_v50, 2102212464 }
  0xaf   :  { %v155_v56 = vsel %vm145_vm6, %v152_v53, %v154_v54  ;;  %v159_v59 = vsel %vm145_vm6, %v156_v55, %v158_v57  ;;  %v150_v31 = vsel %vm146_vm5, %v134_v49, %v149_v18  ;;  %vm255_vm3 = vweird.f32 %v374_v17 }
  0xb0   :  { %v185_v61 = vand.u32 65535, %v155_v56  ;;  %v186_v62 = vshrl.u32 %v155_v56, 16  ;;  %v163_v63 = vand.u32 65535, %v159_v59  ;;  %v164_v0 = vshrl.u32 %v159_v59, 16 }
  0xb1   :  { %v151_v26 = vsel %vm145_vm6, %v148_v30, %v150_v31 }
  0xb2   :  { %v188_v1 = vmul.u32 %v186_v62, %v161_v58  ;;  %v189_v2 = vmul.u32 %v185_v61, %v162_v60  ;;  %v166_v3 = vmul.u32 %v164_v0, %v161_v58  ;;  %v167_v4 = vmul.u32 %v163_v63, %v162_v60 }
  0xb3   :  { %v187_v5 = vmul.u32 %v185_v61, %v161_v58  ;;  %v165_v7 = vmul.u32 %v163_v63, %v161_v58  ;;  %v190_v9 = vmul.u32 %v186_v62, %v162_v60  ;;  %v168_v10 = vmul.u32 %v164_v0, %v162_v60 }
  0xb4   :  { %v191_v6 = vshll.u32 %v188_v1, 16  ;;  %v169_v8 = vshll.u32 %v166_v3, 16  ;;  %v193_v11 = vshll.u32 %v189_v2, 16  ;;  %v171_v13 = vshll.u32 %v167_v4, 16 }
  0xb5   :  { %v192_v27 = vshrl.u32 %v188_v1, 16  ;;  %v170_v32 = vshrl.u32 %v166_v3, 16  ;;  %v194_v34 = vshrl.u32 %v189_v2, 16  ;;  %v172_v37 = vshrl.u32 %v167_v4, 16 }
  0xb6   :  { %vm195_vm7 = vc.u32 %v187_v5, %v191_v6  ;;  %v197_v12 = vadd.s32 %v191_v6, %v187_v5  ;;  %vm173_vm8 = vc.u32 %v165_v7, %v169_v8  ;;  %v175_v14 = vadd.s32 %v169_v8, %v165_v7 }
  0xb7   :  { %v196_v16 = vsel %vm195_vm7, 1, %v335_v15  ;;  %v174_v19 = vsel %vm173_vm8, 1, %v335_v15  ;;  %v205_v42 = vmul.u32 %v389_v48, %v151_v26 }
  0xb8   :  { %v198_v20 = vadd.s32 %v196_v16, %v190_v9  ;;  %vm199_vm9 = vc.u32 %v197_v12, %v193_v11  ;;  %v176_v23 = vadd.s32 %v174_v19, %v168_v10  ;;  %vm177_vm10 = vc.u32 %v175_v14, %v171_v13 }
  0xb9   :  { %v200_v24 = vsel %vm199_vm9, 1, %v335_v15  ;;  %v178_v25 = vsel %vm177_vm10, 1, %v335_v15  ;;  %v201_v40 = vadd.s32 %v197_v12, %v193_v11 }
  0xba   :  { %v202_v29 = vadd.s32 %v200_v24, %v198_v20  ;;  %v180_v33 = vadd.s32 %v178_v25, %v176_v23 }
  0xbc   :  { %v203_v35 = vadd.s32 %v202_v29, %v192_v27  ;;  %v181_v38 = vadd.s32 %v180_v33, %v170_v32 }
  0xbe   :  { %v204_v36 = vadd.s32 %v203_v35, %v194_v34  ;;  %v182_v39 = vadd.s32 %v181_v38, %v172_v37 }
  0xc0   :  { %v208_v41 = vadd.s32 1, %v204_v36  ;;  %vm207_vm11 = vc.u32 %v182_v39, %v201_v40  ;;  %v206_v54 = vadd.s32 %v201_v40, %v182_v39 }
  0xc2   :  { %v209_v43 = vsel %vm207_vm11, %v208_v41, %v204_v36 }
  0xc3   :  { %v210_v44 = vadd.s32 %v209_v43, %v205_v42 }
  0xc5   :  { %v211_v45 = vadd.s32 536870912, %v210_v44 }
  0xc7   :  { %v212_v46 = vshrl.u32 %v211_v45, 30 }
  0xc9   :  { %v213_v47 = vshll.u32 %v212_v46, 30  ;;  %v236_v3 = vsub.s32 4, %v212_v46 }
  0xcb   :  { %v214_v49 = vsub.s32 %v210_v44, %v213_v47  ;;  %v237_v8 = vsel %vm114_vm14, %v236_v3, %v212_v46 }
  0xcc   :  { %v239_v11 = vsel %vm113_vm15, 0, %v237_v8 }
  0xcd   :  { %vm215_vm12 = vcmp.lt.s32.totalorder %v214_v49, 0  ;;  %v216_v50 = vsub.s32 0, %v214_v49  ;;  %v256_v16 = vadd.s32 3, %v239_v11 }
  0xcf   :  { %v217_v51 = vsel %vm215_vm12, %v216_v50, %v214_v49  ;;  %v257_v22 = vand.u32 3, %v256_v16 }
  0xd0   :  { %v218_v52 = vclz %v217_v51 }
  0xd1   :  { %vm259_vm0 = vcmp.eq.s32.totalorder %v257_v22, 0  ;;  %vm262_vm1 = vcmp.eq.s32.totalorder %v257_v22, 2  ;;  %vm258_vm2 = vcmp.lt.s32.totalorder %v257_v22, 2 }
  0xd2   :  { %v291_v53 = vadd.s32 4294967294, %v218_v52 }
  0xd4   :  { %vm292_vm13 = vcmp.lt.s32.totalorder %v291_v53, 0 }
  0xd5   :  { %v221_v28 = vsel %vm292_vm13, 0, %v291_v53 }
  0xd6   :  { %v222_v55 = vsub.s32 32, %v221_v28  ;;  %v226_v56 = vsub.s32 4294967266, %v221_v28  ;;  %v223_v57 = vshll.u32 %v214_v49, %v221_v28 }
  0xd8   :  { %v224_v58 = vshrl.u32 %v206_v54, %v222_v55  ;;  %v227_v48 = vadd.s32 127, %v226_v56 }
  0xda   :  { %v225_v59 = vor.u32 %v224_v58, %v223_v57  ;;  %v228_v60 = vshll.u32 %v227_v48, 23 }
  0xdc   :  { %v229_v61 = vor.u32 4788187, %v228_v60  ;;  %v232_v63 = vcvt.s32.f32 %v225_v59 }
  0xde   :  { %v230_v62 = vand.u32 2147483647, %v229_v61 }
  0xe0   :  { %v233_v0 = vmul.f32 %v232_v63, %v230_v62 }
  0xe2   :  { %v234_v1 = vxor.u32 2147483648, %v233_v0 }
  0xe4   :  { %v235_v2 = vsel %vm114_vm14, %v234_v1, %v233_v0 }
  0xe5   :  { %v238_v4 = vsel %vm113_vm15, %v374_v17, %v235_v2 }
  0xe6   :  { %v240_v5 = vmul.f32 %v238_v4, %v238_v4 }
  0xe8   :  { %v241_v6 = vmul.f32 -0.001358992, %v240_v5  ;;  %v248_v7 = vmul.f32 -0.00019511016, %v240_v5 }
  0xea   :  { %v242_v9 = vadd.f32 0.041655596, %v241_v6  ;;  %v249_v10 = vadd.f32 0.008332121, %v248_v7 }
  0xec   :  { %v243_v12 = vmul.f32 %v242_v9, %v240_v5  ;;  %v250_v13 = vmul.f32 %v249_v10, %v240_v5 }
  0xee   :  { %v244_v14 = vadd.f32 -0.4999988, %v243_v12  ;;  %v251_v15 = vadd.f32 -0.16666654, %v250_v13 }
  0xf0   :  { %v245_v18 = vmul.f32 %v244_v14, %v240_v5  ;;  %v252_v19 = vmul.f32 %v251_v15, %v240_v5 }
  0xf2   :  { %v246_v20 = vadd.f32 1.0, %v245_v18  ;;  %v253_v21 = vadd.f32 1.0, %v252_v19 }
  0xf4   :  { %v254_v23 = vmul.f32 %v253_v21, %v238_v4  ;;  %v263_v24 = vxor.u32 2147483648, %v246_v20 }
  0xf6   :  { %v260_v25 = vxor.u32 2147483648, %v254_v23  ;;  %v264_v29 = vsel %vm262_vm1, %v263_v24, %v254_v23 }
  0xf8   :  { %v261_v27 = vsel %vm259_vm0, %v246_v20, %v260_v25 }
  0xf9   :  { %v265_v30 = vsel %vm258_vm2, %v261_v27, %v264_v29 }
  0xfa   :  { %v266_v31 = vsel %vm255_vm3, nan, %v265_v30 }
  0xfb   :  { %267 = vst [vmem:[#allocation2] sm:$0xff] %v266_v31 }
  0xfc   :  { %278 = dma.vmem_to_hbm [thread:$0]  %s274_s3, 128, %s276_s23, [#allocation3]  }
  0xfd   :  { %327 = dma.done.wait [#allocation3], 128  }
  0xfe   :  { %328 = vsyncadd [#allocation3], 4294967168 }
  0xff   :  { %283 = vsyncpa [#allocation3], 1 }

</bundles_post_ra>
